<compile_context>
chip_gen: v6e
topology: v6e:2x2x1
jax: 0.10.0
libtpu: 0.0.40
codegen_flags: <defaults>
</compile_context>

<pallas_src>
from functools import partial

import jax
import jax.numpy as jnp
from jax.experimental import pallas as pl
from jax.experimental.pallas import tpu as pltpu

NEG_SLOPE = 0.2   # RReLU(lower=0.1, upper=0.3) in eval mode
LANE = 128        # pad channel (lane) dims to this
SUBLANE = 8       # pad row (sublane) dims to this


def _rrelu_eval(x):
    return jnp.where(x >= 0, x, NEG_SLOPE * x)


def _round_up(v, m):
    return (v + m - 1) // m * m


def gcn_kernel(a_ref, x_ref, w_ref, b_ref, m_ref, o_ref):
    """Fused 4-layer GCN on one VMEM-resident, zero-padded batch slab.

    a_ref : (BNp, BNp)  bf16  block-diagonal normalized adjacency (zero padded)
    x_ref : (BNp, Cp)   bf16  flattened node features (zero padded)
    w_ref : (4, Cp, Cp) bf16  packed layer weights (zero padded)
    b_ref : (4, 1, Cp)  f32   packed layer biases (zero padded)
    m_ref : (Bp, BNp)   bf16  mean-over-nodes matrix (1/N on each batch's node rows)
    o_ref : (Bp, Cp)    f32   padded output slab; wrapper slices [:B, :Cout]
    """
    f32, bf16 = jnp.float32, jnp.bfloat16
    A = a_ref[...]
    X = x_ref[...]

    def conv(feat_bf16, li):
        # GCNConv: A_hat @ (feat @ W_li) + b_li -- MXU matmuls, f32 accumulation.
        xw = jnp.dot(feat_bf16, w_ref[li], preferred_element_type=f32)
        return jnp.dot(A, xw.astype(bf16), preferred_element_type=f32) + b_ref[li]

    # Layer 1 reordered as (A @ X) @ W1: cheaper when in_channels < hidden_channels.
    ax = jnp.dot(A, X, preferred_element_type=f32)
    h1 = jnp.dot(ax.astype(bf16), w_ref[0], preferred_element_type=f32) + b_ref[0]
    x1 = _rrelu_eval(h1)
    h2 = conv(x1.astype(bf16), 1) + h1
    x2 = _rrelu_eval(h2)
    h3 = conv(x2.astype(bf16), 2) + h2
    x3 = _rrelu_eval(h3)
    # Residual h3[:, :out_channels]: the conv4 columns >= out_channels are exactly zero
    # (zero-padded W4/b4), so adding full h3 only touches columns that the wrapper slices away.
    h4 = conv(x3.astype(bf16), 3) + h3
    # Mean over nodes as an MXU matmul (keeps the reduction off the XLU) and produces a
    # lane/sublane-dense (Bp, Cp) output slab -> unmasked vector stores.
    o_ref[...] = jnp.dot(m_ref[...], h4.astype(bf16), preferred_element_type=f32)


@jax.jit
def gcn_forward(x, a_hat, params):
    B, N, Cin = x.shape
    H = params["w1"].shape[1]
    Cout = params["w4"].shape[1]
    # The module's h3[:, :, :out_channels] residual implicitly requires this.
    assert Cout <= H, "out_channels must be <= hidden_channels"

    Cp = _round_up(max(Cin, H, Cout), LANE)
    BN = B * N
    BNp = _round_up(BN, SUBLANE)
    Bp = _round_up(B, SUBLANE)

    # Flattened, zero-padded node features: row b*N + j == x[b, j].
    x2d = jnp.zeros((BNp, Cp), jnp.float32).at[:BN, :Cin].set(x.reshape(BN, Cin))

    # Block-diagonal adjacency (one block per batch element, shared graph) so the whole
    # batch is a single 2-D matmul per layer -- no per-batch grid steps.
    a_blk = jnp.zeros((BNp, BNp), jnp.float32)
    a_blk = a_blk.at[:BN, :BN].set(jnp.kron(jnp.eye(B, dtype=jnp.float32), a_hat))

    # Pack the 8 parameter tensors into 2 operands (fewer DMA descriptors / buffers).
    w_all = jnp.zeros((4, Cp, Cp), jnp.float32)
    w_all = w_all.at[0, :Cin, :H].set(params["w1"])
    w_all = w_all.at[1, :H, :H].set(params["w2"])
    w_all = w_all.at[2, :H, :H].set(params["w3"])
    w_all = w_all.at[3, :H, :Cout].set(params["w4"])

    b_all = jnp.zeros((4, 1, Cp), jnp.float32)
    b_all = b_all.at[0, 0, :H].set(params["b1"])
    b_all = b_all.at[1, 0, :H].set(params["b2"])
    b_all = b_all.at[2, 0, :H].set(params["b3"])
    b_all = b_all.at[3, 0, :Cout].set(params["b4"])

    # Mean-over-nodes matrix: out[b] = (1/N) * sum_j h4[b*N + j]; pad rows have weight 0,
    # so padded garbage never reaches the real output.
    m_mat = jnp.zeros((Bp, BNp), jnp.float32)
    m_mat = m_mat.at[:B, :BN].set(
        jnp.kron(jnp.eye(B, dtype=jnp.float32), jnp.full((1, N), 1.0 / N, jnp.float32)))

    # bf16 at the call boundary (native MXU rate, half the HBM/VMEM traffic for the N^2
    # adjacency); accumulation inside the kernel stays f32.
    a_blk = a_blk.astype(jnp.bfloat16)
    x2d = x2d.astype(jnp.bfloat16)
    w_all = w_all.astype(jnp.bfloat16)
    m_mat = m_mat.astype(jnp.bfloat16)

    out_p = pl.pallas_call(
        gcn_kernel,
        out_shape=jax.ShapeDtypeStruct((Bp, Cp), jnp.float32),
        # Single grid step: the whole padded batch (~a few hundred KiB here) is VMEM
        # resident, so there is no per-batch pipeline / masked-store overhead.
        # TODO(synk): for large N (A_hat scales as N^2) or large B, tile node-row blocks
        # over a grid axis, single-buffer the constant operands and raise vmem_limit_bytes.
        grid=(1,),
        in_specs=[
            pl.BlockSpec((BNp, BNp), lambda i: (0, 0)),        # A_blk
            pl.BlockSpec((BNp, Cp), lambda i: (0, 0)),         # x slab
            pl.BlockSpec((4, Cp, Cp), lambda i: (0, 0, 0)),    # packed weights
            pl.BlockSpec((4, 1, Cp), lambda i: (0, 0, 0)),     # packed biases
            pl.BlockSpec((Bp, BNp), lambda i: (0, 0)),         # mean matrix
        ],
        out_specs=pl.BlockSpec((Bp, Cp), lambda i: (0, 0)),
        compiler_params=pltpu.CompilerParams(
            dimension_semantics=("arbitrary",)),
    )(a_blk, x2d, w_all, b_all, m_mat)

    return out_p[:B, :Cout]


def normalized_adjacency(edge_index, num_nodes):
    """Dense equivalent of PyG GCNConv's gcn_norm: D^{-1/2}(A+I)D^{-1/2}."""
    src, dst = edge_index[0], edge_index[1]
    A = jnp.zeros((num_nodes, num_nodes), jnp.float32)
    A = A.at[dst, src].add(1.0)                        # message flows source -> target
    A = A + jnp.eye(num_nodes, dtype=jnp.float32)      # add self loops
    deg = jnp.sum(A, axis=1)
    dinv = jnp.where(deg > 0, 1.0 / jnp.sqrt(deg), 0.0)
    return A * dinv[:, None] * dinv[None, :]


def init_params(key, in_channels, hidden_channels, out_channels):
    ks = jax.random.split(key, 8)

    def glorot(k, fan_in, fan_out):
        scale = jnp.sqrt(6.0 / (fan_in + fan_out))
        return jax.random.uniform(k, (fan_in, fan_out), jnp.float32, -scale, scale)

    def bias(k, n):  # small nonzero biases so the bias path is actually exercised
        return jax.random.uniform(k, (n,), jnp.float32, -0.1, 0.1)

    return {
        "w1": glorot(ks[0], in_channels, hidden_channels),
        "b1": bias(ks[1], hidden_channels),
        "w2": glorot(ks[2], hidden_channels, hidden_channels),
        "b2": bias(ks[3], hidden_channels),
        "w3": glorot(ks[4], hidden_channels, hidden_channels),
        "b3": bias(ks[5], hidden_channels),
        "w4": glorot(ks[6], hidden_channels, out_channels),
        "b4": bias(ks[7], out_channels),
    }


def gcn_reference(x, a_hat, params, out_channels):
    """Pure-JAX f32 reference of the same forward pass (for sanity checking)."""
    def conv(feat, w, b):
        return jnp.einsum("ij,bjc->bic", a_hat, feat @ w) + b

    h1 = conv(x, params["w1"], params["b1"])
    x1 = _rrelu_eval(h1)
    h2 = conv(x1, params["w2"], params["b2"]) + h1
    x2 = _rrelu_eval(h2)
    h3 = conv(x2, params["w3"], params["b3"]) + h2
    x3 = _rrelu_eval(h3)
    h4 = conv(x3, params["w4"], params["b4"]) + h3[:, :, :out_channels]
    return jnp.mean(h4, axis=1)


if __name__ == "__main__":
    B, N = 2, 16                       # batch, nodes
    in_channels, hidden_channels, out_channels = 4, 32, 8

    key = jax.random.PRNGKey(0)
    k_x, k_p = jax.random.split(key)

    # Node features (B, N, Cin).
    x = jax.random.normal(k_x, (B, N, in_channels), jnp.float32)

    # Bidirectional ring graph: edge_index shape (2, 2N).
    nodes = jnp.arange(N, dtype=jnp.int32)
    src = jnp.concatenate([nodes, (nodes + 1) % N])
    dst = jnp.concatenate([(nodes + 1) % N, nodes])
    edge_index = jnp.stack([src, dst])

    a_hat = normalized_adjacency(edge_index, N)
    params = init_params(k_p, in_channels, hidden_channels, out_channels)

    out = gcn_forward(x, a_hat, params)
    out = jax.block_until_ready(out)

    ref = gcn_reference(x, a_hat, params, out_channels)
    assert out.shape == (B, out_channels)
    # bf16 operands on the MXU -> loose tolerance vs. the pure-f32 reference.
    max_err = float(jnp.max(jnp.abs(out - ref)))
    assert jnp.allclose(out, ref, atol=5e-2, rtol=5e-2), \
        f"mismatch vs JAX reference: max abs err {max_err:.4f}"

    print("KERNEL_OK")
</pallas_src>

<mosaic_0001>
module attributes {stable_mosaic.version = 11 : i64} {
  func.func @gcn_kernel(%arg0: i32, %arg1: memref<32x32xbf16, #tpu.memory_space<vmem>>, %arg2: memref<32x128xbf16, #tpu.memory_space<vmem>>, %arg3: memref<4x128x128xbf16, #tpu.memory_space<vmem>>, %arg4: memref<4x1x128xf32, #tpu.memory_space<vmem>>, %arg5: memref<8x32xbf16, #tpu.memory_space<vmem>>, %arg6: memref<8x128xf32, #tpu.memory_space<vmem>>) attributes {dimension_semantics = [#tpu.dimension_semantics<arbitrary>], iteration_bounds = array<i64: 1>, scalar_prefetch = 0 : i64, scratch_operands = 0 : i64, tpu.core_type = #tpu.core_type<tc>, window_params = [{pipeline_mode = #tpu.pipeline_mode<synchronous>, transform_indices = @transform_0, window_bounds = array<i64: 32, 32>}, {pipeline_mode = #tpu.pipeline_mode<synchronous>, transform_indices = @transform_1, window_bounds = array<i64: 32, 128>}, {pipeline_mode = #tpu.pipeline_mode<synchronous>, transform_indices = @transform_2, window_bounds = array<i64: 4, 128, 128>}, {pipeline_mode = #tpu.pipeline_mode<synchronous>, transform_indices = @transform_3, window_bounds = array<i64: 4, 1, 128>}, {pipeline_mode = #tpu.pipeline_mode<synchronous>, transform_indices = @transform_4, window_bounds = array<i64: 8, 32>}, {pipeline_mode = #tpu.pipeline_mode<synchronous>, transform_indices = @transform_5, window_bounds = array<i64: 8, 128>}]} {
    %c0 = arith.constant 0 : index
    %c0_0 = arith.constant 0 : index
    %0 = vector.load %arg1[%c0, %c0_0] : memref<32x32xbf16, #tpu.memory_space<vmem>>, vector<32x32xbf16>
    %c0_1 = arith.constant 0 : index
    %c0_2 = arith.constant 0 : index
    %1 = vector.load %arg2[%c0_1, %c0_2] : memref<32x128xbf16, #tpu.memory_space<vmem>>, vector<32x128xbf16>
    %cst = arith.constant dense<0.000000e+00> : vector<32x128xf32>
    %2 = tpu.matmul %0, %1, %cst {dimension_numbers = #tpu.dot_dimension_numbers<[1], [0], [0], [1], [0, 0, 1, 1], [], []>} : vector<32x32xbf16>, vector<32x128xbf16>, vector<32x128xf32> -> vector<32x128xf32>
    %3 = arith.truncf %2 : vector<32x128xf32> to vector<32x128xbf16>
    %c0_3 = arith.constant 0 : index
    %c0_4 = arith.constant 0 : index
    %c0_5 = arith.constant 0 : index
    %4 = vector.load %arg3[%c0_3, %c0_4, %c0_5] : memref<4x128x128xbf16, #tpu.memory_space<vmem>>, vector<1x128x128xbf16>
    %5 = vector.shape_cast %4 : vector<1x128x128xbf16> to vector<128x128xbf16>
    %cst_6 = arith.constant dense<0.000000e+00> : vector<32x128xf32>
    %6 = tpu.matmul %3, %5, %cst_6 {dimension_numbers = #tpu.dot_dimension_numbers<[1], [0], [0], [1], [0, 0, 1, 1], [], []>} : vector<32x128xbf16>, vector<128x128xbf16>, vector<32x128xf32> -> vector<32x128xf32>
    %c0_7 = arith.constant 0 : index
    %c0_8 = arith.constant 0 : index
    %c0_9 = arith.constant 0 : index
    %7 = vector.load %arg4[%c0_7, %c0_8, %c0_9] : memref<4x1x128xf32, #tpu.memory_space<vmem>>, vector<1x1x128xf32>
    %8 = vector.shape_cast %7 : vector<1x1x128xf32> to vector<1x128xf32>
    %9 = vector.broadcast %8 : vector<1x128xf32> to vector<32x128xf32>
    %10 = arith.addf %6, %9 : vector<32x128xf32>
    %cst_10 = arith.constant 0.000000e+00 : f32
    %11 = vector.broadcast %cst_10 : f32 to vector<32x128xf32>
    %12 = arith.cmpf oge, %10, %11 : vector<32x128xf32>
    %cst_11 = arith.constant 2.000000e-01 : f32
    %13 = vector.broadcast %cst_11 : f32 to vector<32x128xf32>
    %14 = arith.mulf %13, %10 : vector<32x128xf32>
    %15 = arith.select %12, %10, %14 : vector<32x128xi1>, vector<32x128xf32>
    %16 = arith.truncf %15 : vector<32x128xf32> to vector<32x128xbf16>
    %c1 = arith.constant 1 : index
    %c0_12 = arith.constant 0 : index
    %c0_13 = arith.constant 0 : index
    %17 = vector.load %arg3[%c1, %c0_12, %c0_13] : memref<4x128x128xbf16, #tpu.memory_space<vmem>>, vector<1x128x128xbf16>
    %18 = vector.shape_cast %17 : vector<1x128x128xbf16> to vector<128x128xbf16>
    %cst_14 = arith.constant dense<0.000000e+00> : vector<32x128xf32>
    %19 = tpu.matmul %16, %18, %cst_14 {dimension_numbers = #tpu.dot_dimension_numbers<[1], [0], [0], [1], [0, 0, 1, 1], [], []>} : vector<32x128xbf16>, vector<128x128xbf16>, vector<32x128xf32> -> vector<32x128xf32>
    %20 = arith.truncf %19 : vector<32x128xf32> to vector<32x128xbf16>
    %cst_15 = arith.constant dense<0.000000e+00> : vector<32x128xf32>
    %21 = tpu.matmul %0, %20, %cst_15 {dimension_numbers = #tpu.dot_dimension_numbers<[1], [0], [0], [1], [0, 0, 1, 1], [], []>} : vector<32x32xbf16>, vector<32x128xbf16>, vector<32x128xf32> -> vector<32x128xf32>
    %c1_16 = arith.constant 1 : index
    %c0_17 = arith.constant 0 : index
    %c0_18 = arith.constant 0 : index
    %22 = vector.load %arg4[%c1_16, %c0_17, %c0_18] : memref<4x1x128xf32, #tpu.memory_space<vmem>>, vector<1x1x128xf32>
    %23 = vector.shape_cast %22 : vector<1x1x128xf32> to vector<1x128xf32>
    %24 = vector.broadcast %23 : vector<1x128xf32> to vector<32x128xf32>
    %25 = arith.addf %21, %24 : vector<32x128xf32>
    %26 = arith.addf %25, %10 : vector<32x128xf32>
    %cst_19 = arith.constant 0.000000e+00 : f32
    %27 = vector.broadcast %cst_19 : f32 to vector<32x128xf32>
    %28 = arith.cmpf oge, %26, %27 : vector<32x128xf32>
    %cst_20 = arith.constant 2.000000e-01 : f32
    %29 = vector.broadcast %cst_20 : f32 to vector<32x128xf32>
    %30 = arith.mulf %29, %26 : vector<32x128xf32>
    %31 = arith.select %28, %26, %30 : vector<32x128xi1>, vector<32x128xf32>
    %32 = arith.truncf %31 : vector<32x128xf32> to vector<32x128xbf16>
    %c2 = arith.constant 2 : index
    %c0_21 = arith.constant 0 : index
    %c0_22 = arith.constant 0 : index
    %33 = vector.load %arg3[%c2, %c0_21, %c0_22] : memref<4x128x128xbf16, #tpu.memory_space<vmem>>, vector<1x128x128xbf16>
    %34 = vector.shape_cast %33 : vector<1x128x128xbf16> to vector<128x128xbf16>
    %cst_23 = arith.constant dense<0.000000e+00> : vector<32x128xf32>
    %35 = tpu.matmul %32, %34, %cst_23 {dimension_numbers = #tpu.dot_dimension_numbers<[1], [0], [0], [1], [0, 0, 1, 1], [], []>} : vector<32x128xbf16>, vector<128x128xbf16>, vector<32x128xf32> -> vector<32x128xf32>
    %36 = arith.truncf %35 : vector<32x128xf32> to vector<32x128xbf16>
    %cst_24 = arith.constant dense<0.000000e+00> : vector<32x128xf32>
    %37 = tpu.matmul %0, %36, %cst_24 {dimension_numbers = #tpu.dot_dimension_numbers<[1], [0], [0], [1], [0, 0, 1, 1], [], []>} : vector<32x32xbf16>, vector<32x128xbf16>, vector<32x128xf32> -> vector<32x128xf32>
    %c2_25 = arith.constant 2 : index
    %c0_26 = arith.constant 0 : index
    %c0_27 = arith.constant 0 : index
    %38 = vector.load %arg4[%c2_25, %c0_26, %c0_27] : memref<4x1x128xf32, #tpu.memory_space<vmem>>, vector<1x1x128xf32>
    %39 = vector.shape_cast %38 : vector<1x1x128xf32> to vector<1x128xf32>
    %40 = vector.broadcast %39 : vector<1x128xf32> to vector<32x128xf32>
    %41 = arith.addf %37, %40 : vector<32x128xf32>
    %42 = arith.addf %41, %26 : vector<32x128xf32>
    %cst_28 = arith.constant 0.000000e+00 : f32
    %43 = vector.broadcast %cst_28 : f32 to vector<32x128xf32>
    %44 = arith.cmpf oge, %42, %43 : vector<32x128xf32>
    %cst_29 = arith.constant 2.000000e-01 : f32
    %45 = vector.broadcast %cst_29 : f32 to vector<32x128xf32>
    %46 = arith.mulf %45, %42 : vector<32x128xf32>
    %47 = arith.select %44, %42, %46 : vector<32x128xi1>, vector<32x128xf32>
    %48 = arith.truncf %47 : vector<32x128xf32> to vector<32x128xbf16>
    %c3 = arith.constant 3 : index
    %c0_30 = arith.constant 0 : index
    %c0_31 = arith.constant 0 : index
    %49 = vector.load %arg3[%c3, %c0_30, %c0_31] : memref<4x128x128xbf16, #tpu.memory_space<vmem>>, vector<1x128x128xbf16>
    %50 = vector.shape_cast %49 : vector<1x128x128xbf16> to vector<128x128xbf16>
    %cst_32 = arith.constant dense<0.000000e+00> : vector<32x128xf32>
    %51 = tpu.matmul %48, %50, %cst_32 {dimension_numbers = #tpu.dot_dimension_numbers<[1], [0], [0], [1], [0, 0, 1, 1], [], []>} : vector<32x128xbf16>, vector<128x128xbf16>, vector<32x128xf32> -> vector<32x128xf32>
    %52 = arith.truncf %51 : vector<32x128xf32> to vector<32x128xbf16>
    %cst_33 = arith.constant dense<0.000000e+00> : vector<32x128xf32>
    %53 = tpu.matmul %0, %52, %cst_33 {dimension_numbers = #tpu.dot_dimension_numbers<[1], [0], [0], [1], [0, 0, 1, 1], [], []>} : vector<32x32xbf16>, vector<32x128xbf16>, vector<32x128xf32> -> vector<32x128xf32>
    %c3_34 = arith.constant 3 : index
    %c0_35 = arith.constant 0 : index
    %c0_36 = arith.constant 0 : index
    %54 = vector.load %arg4[%c3_34, %c0_35, %c0_36] : memref<4x1x128xf32, #tpu.memory_space<vmem>>, vector<1x1x128xf32>
    %55 = vector.shape_cast %54 : vector<1x1x128xf32> to vector<1x128xf32>
    %56 = vector.broadcast %55 : vector<1x128xf32> to vector<32x128xf32>
    %57 = arith.addf %53, %56 : vector<32x128xf32>
    %58 = arith.addf %57, %42 : vector<32x128xf32>
    %c0_37 = arith.constant 0 : index
    %c0_38 = arith.constant 0 : index
    %59 = vector.load %arg5[%c0_37, %c0_38] : memref<8x32xbf16, #tpu.memory_space<vmem>>, vector<8x32xbf16>
    %60 = arith.truncf %58 : vector<32x128xf32> to vector<32x128xbf16>
    %cst_39 = arith.constant dense<0.000000e+00> : vector<8x128xf32>
    %61 = tpu.matmul %59, %60, %cst_39 {dimension_numbers = #tpu.dot_dimension_numbers<[1], [0], [0], [1], [0, 0, 1, 1], [], []>} : vector<8x32xbf16>, vector<32x128xbf16>, vector<8x128xf32> -> vector<8x128xf32>
    %c0_40 = arith.constant 0 : index
    %c0_41 = arith.constant 0 : index
    %62 = vector.load %arg6[%c0_40, %c0_41] : memref<8x128xf32, #tpu.memory_space<vmem>>, vector<8x128xf32>
    tpu.vector_store %arg6[%c0_40, %c0_41], %61 {strides = array<i32>} : memref<8x128xf32, #tpu.memory_space<vmem>>, vector<8x128xf32>,
    return
  }
  func.func @transform_0(%arg0: i32) -> (i32, i32) {
    %c0_i32 = arith.constant 0 : i32
    %c0_i32_0 = arith.constant 0 : i32
    %c0_i32_1 = arith.constant 0 : i32
    return %c0_i32, %c0_i32_0 : i32, i32
  }
  func.func @transform_1(%arg0: i32) -> (i32, i32) {
    %c0_i32 = arith.constant 0 : i32
    %c0_i32_0 = arith.constant 0 : i32
    %c0_i32_1 = arith.constant 0 : i32
    return %c0_i32, %c0_i32_0 : i32, i32
  }
  func.func @transform_2(%arg0: i32) -> (i32, i32, i32) {
    %c0_i32 = arith.constant 0 : i32
    %c0_i32_0 = arith.constant 0 : i32
    %c0_i32_1 = arith.constant 0 : i32
    %c0_i32_2 = arith.constant 0 : i32
    return %c0_i32, %c0_i32_0, %c0_i32_1 : i32, i32, i32
  }
  func.func @transform_3(%arg0: i32) -> (i32, i32, i32) {
    %c0_i32 = arith.constant 0 : i32
    %c0_i32_0 = arith.constant 0 : i32
    %c0_i32_1 = arith.constant 0 : i32
    %c0_i32_2 = arith.constant 0 : i32
    return %c0_i32, %c0_i32_0, %c0_i32_1 : i32, i32, i32
  }
  func.func @transform_4(%arg0: i32) -> (i32, i32) {
    %c0_i32 = arith.constant 0 : i32
    %c0_i32_0 = arith.constant 0 : i32
    %c0_i32_1 = arith.constant 0 : i32
    return %c0_i32, %c0_i32_0 : i32, i32
  }
  func.func @transform_5(%arg0: i32) -> (i32, i32) {
    %c0_i32 = arith.constant 0 : i32
    %c0_i32_0 = arith.constant 0 : i32
    %c0_i32_1 = arith.constant 0 : i32
    return %c0_i32, %c0_i32_0 : i32, i32
  }
}

</mosaic_0001>

<bundles_post_ra>
// kernel: gcn_forward.1
= control target key start
LH: loop header
LB: loop body
LE: loop exit
PB: predicated region body
PF: predicated region fallthrough
CT: control target
= control target key end

     0   :  { %vm51_vm0 = vcmask 261120   ;;  %vm1171_vm13 = vmmov 0   ;;  %s1397_s1 = inlined_call_operand.vmem [shape: bf16[32,128], index: 1, kind: input, shape index: {}]   ;;  %s1398_s0 = inlined_call_operand.vmem [shape: bf16[32,32], index: 0, kind: input, shape index: {}]   ;;  %s1399_s2 = inlined_call_operand.vmem [shape: bf16[4,128,128], index: 2, kind: input, shape index: {}]   ;;  %s1400_s3 = inlined_call_operand.vmem [shape: f32[4,1,128], index: 3, kind: input, shape index: {}]   ;;  %s1401_s4 = inlined_call_operand.vmem [shape: bf16[8,32], index: 4, kind: input, shape index: {}]   ;;  %s1402_s5 = inlined_call_operand.vmem [shape: f32[8,128], index: 5, kind: output, shape index: {}]  }
   0x1   :  { %v1134_v0 = vld [vmem:[%s1397_s1 + $0x8] sm:$0xff]   ;;  %v1135_v1 = vld [vmem:[%s1397_s1] sm:$0xff]   ;;  %v1138_v3 = vld [vmem:[%s1399_s2 + $0x38] sm:$0xff]  }
   0x2   :  { %1012 = vmatprep.subr.bf16.mxu0 %v1134_v0  ;;  %v1211_v2 = vld [vmem:[%s1398_s0] sm:$0xff]   ;;  %v1139_v4 = vld [vmem:[%s1399_s2 + $0x30] sm:$0xff]   ;;  %v1224_v5 = vld [vmem:[%s1398_s0 + $0x8] sm:$0xff]   ;;  %1020 = vmatprep.subr.bf16.mxu1 %v1138_v3 }
   0x3   :  { %1013 = vmatpush3.bf16.msra.mxu0 %v1134_v0  ;;  %1016 = vmatprep.mubr.msk.bf16.mxu0 %vm51_vm0, %v1211_v2  ;;  %v1140_v6 = vld [vmem:[%s1399_s2 + $0x28] sm:$0xff]   ;;  %v1141_v7 = vld [vmem:[%s1399_s2 + $0x20] sm:$0xff]   ;;  %v1142_v8 = vld [vmem:[%s1399_s2 + $0x18] sm:$0xff]  }
   0x4   :  { %1014 = vmatprep.subr.bf16.mxu0 %v1135_v1  ;;  %1021 = vmatpush3.bf16.msra.mxu1 %v1138_v3  ;;  %v1143_v9 = vld [vmem:[%s1399_s2 + $0x10] sm:$0xff]   ;;  %v1144_v10 = vld [vmem:[%s1399_s2 + $0x8] sm:$0xff]   ;;  %v1145_v11 = vld [vmem:[%s1399_s2] sm:$0xff]  }
   0x5   :  { %1022 = vmatprep.subr.bf16.mxu1 %v1139_v4  ;;  %v1146_v12 = vld [vmem:[%s1399_s2 + $0x78] sm:$0xff]   ;;  %v1147_v13 = vld [vmem:[%s1399_s2 + $0x70] sm:$0xff]   ;;  %v1148_v14 = vld [vmem:[%s1399_s2 + $0x68] sm:$0xff]  }
   0x6   :  { %v1149_v15 = vld [vmem:[%s1399_s2 + $0x60] sm:$0xff]   ;;  %v1150_v16 = vld [vmem:[%s1399_s2 + $0x58] sm:$0xff]   ;;  %v1151_v23 = vld [vmem:[%s1399_s2 + $0x50] sm:$0xff]  }
   0x7   :  { %1015 = vmatpush3.bf16.msra.mxu0 %v1135_v1  ;;  %v1152_v24 = vld [vmem:[%s1399_s2 + $0x48] sm:$0xff]   ;;  %v1153_v25 = vld [vmem:[%s1399_s2 + $0x40] sm:$0xff]   ;;  %v1154_v45 = vld [vmem:[%s1399_s2 + $0xb8] sm:$0xff]  }
   0x8   :  { %1023 = vmatpush3.bf16.msra.mxu1 %v1139_v4  ;;  %1040 = vmatprep.subr.bf16.mxu0 %v1146_v12  ;;  %v859_v27 = vld [vmem:[%s1400_s3] ss:$0 sm:$0xff]  ;;  %v1155_v46 = vld [vmem:[%s1399_s2 + $0xb0] sm:$0xff]   ;;  %v1156_v47 = vld [vmem:[%s1399_s2 + $0xa8] sm:$0xff]  }
   0x9   :  { %1024 = vmatprep.subr.bf16.mxu1 %v1140_v6  ;;  %v1157_v48 = vld [vmem:[%s1399_s2 + $0xa0] sm:$0xff]   ;;  %v1158_v55 = vld [vmem:[%s1399_s2 + $0x98] sm:$0xff]   ;;  %v1159_v56 = vld [vmem:[%s1399_s2 + $0x90] sm:$0xff]  }
   0xa   :  { %1017 = vmatmul.mubr.msk.bf16.vlgmr.msra.gmra.mxu0 %vm51_vm0, %v1224_v5  ;;  %v1160_v57 = vld [vmem:[%s1399_s2 + $0x88] sm:$0xff]   ;;  %v1161_v58 = vld [vmem:[%s1399_s2 + $0x80] sm:$0xff]  }
   0xb   :  { %1041 = vmatpush3.bf16.msra.mxu0 %v1146_v12  ;;  %v893_v59 = vld [vmem:[%s1400_s3 + $0x1] ss:$0 sm:$0xff] }
   0xc   :  { %1025 = vmatpush3.bf16.msra.mxu1 %v1140_v6  ;;  %1042 = vmatprep.subr.bf16.mxu0 %v1147_v13 }
   0xd   :  { %1026 = vmatprep.subr.bf16.mxu1 %v1141_v7 }
   0xf   :  { %1043 = vmatpush3.bf16.msra.mxu0 %v1147_v13 }
  0x10   :  { %1027 = vmatpush3.bf16.msra.mxu1 %v1141_v7  ;;  %1044 = vmatprep.subr.bf16.mxu0 %v1148_v14 }
  0x11   :  { %1028 = vmatprep.subr.bf16.mxu1 %v1142_v8 }
  0x13   :  { %1045 = vmatpush3.bf16.msra.mxu0 %v1148_v14 }
  0x14   :  { %1029 = vmatpush3.bf16.msra.mxu1 %v1142_v8  ;;  %1046 = vmatprep.subr.bf16.mxu0 %v1149_v15 }
  0x15   :  { %1030 = vmatprep.subr.bf16.mxu1 %v1143_v9 }
  0x17   :  { %1047 = vmatpush3.bf16.msra.mxu0 %v1149_v15 }
  0x18   :  { %1031 = vmatpush3.bf16.msra.mxu1 %v1143_v9  ;;  %1048 = vmatprep.subr.bf16.mxu0 %v1150_v16 }
  0x19   :  { %1032 = vmatprep.subr.bf16.mxu1 %v1144_v10 }
  0x1b   :  { %1049 = vmatpush3.bf16.msra.mxu0 %v1150_v16 }
  0x1c   :  { %1033 = vmatpush3.bf16.msra.mxu1 %v1144_v10  ;;  %1050 = vmatprep.subr.bf16.mxu0 %v1151_v23 }
  0x1d   :  { %1034 = vmatprep.subr.bf16.mxu1 %v1145_v11 }
  0x1f   :  { %1051 = vmatpush3.bf16.msra.mxu0 %v1151_v23 }
  0x20   :  { %1035 = vmatpush3.bf16.msra.mxu1 %v1145_v11  ;;  %1052 = vmatprep.subr.bf16.mxu0 %v1152_v24 }
  0x23   :  { %1053 = vmatpush3.bf16.msra.mxu0 %v1152_v24 }
  0x24   :  { %1054 = vmatprep.subr.bf16.mxu0 %v1153_v25 }
  0x27   :  { %1055 = vmatpush3.bf16.msra.mxu0 %v1153_v25 }
  0x28   :  { %1068 = vmatprep.subr.bf16.mxu0 %v1154_v45 }
  0xca   :  { %v1018_v17 = vpop.f32.mrf.mxu0 }
  0xcc   :  { %v92_v18 = vpop.f32.mrf.mxu0 }
  0xce   :  { %v1019_v19 = vpop.f32.mrf.mxu0 }
  0xcf   :  { %v108_v22 = vpack.c.bf16 %v1019_v19, %v1018_v17 }
  0xd0   :  { %v95_v20 = vpop.f32.mrf.mxu0 }
  0xd1   :  { %v107_v21 = vpack.c.bf16 %v95_v20, %v92_v18 }
  0xd3   :  { %1036 = vmatprep.mubr.bf16.mxu1 %v107_v21 }
  0xd4   :  { %1037 = vmatmul.mubr.bf16.vlgmr.msra.gmra.mxu1 %v108_v22 }
  0xd5   :  { %1064 = vmatprep.mubr.msk.bf16.mxu1 %vm51_vm0, %v1211_v2 }
 0x194   :  { %v1038_v26 = vpop.f32.mrf.mxu1 }
 0x195   :  { %v1277_v30 = vadd.f32 %v1038_v26, %v859_v27  ;;  %v1162_v26 = vld [vmem:[%s1399_s2 + $0xf8] sm:$0xff]  }
 0x196   :  { %v214_v28 = vpop.f32.mrf.mxu1 }
 0x197   :  { %v1275_v29 = vadd.f32 %v859_v27, %v214_v28  ;;  %v235_v37 = vmul.f32 0.2, %v1277_v30  ;;  %vm231_vm3 = vcmp.ge.f32.partialorder %v1277_v30, 0.0  ;;  %v1165_v28 = vld [vmem:[%s1399_s2 + $0xe0] sm:$0xff]  }
 0x198   :  { %v1039_v31 = vpop.f32.mrf.mxu1 }
 0x199   :  { %v1279_v32 = vadd.f32 %v1039_v31, %v859_v27  ;;  %v233_v34 = vmul.f32 0.2, %v1275_v29  ;;  %vm229_vm2 = vcmp.ge.f32.partialorder %v1275_v29, 0.0  ;;  %v239_v43 = vsel %vm231_vm3, %v1277_v30, %v235_v37  ;;  %v1168_v31 = vld [vmem:[%s1399_s2 + $0xc8] sm:$0xff]  }
 0x19a   :  { %v217_v33 = vpop.f32.mrf.mxu1 }
 0x19b   :  { %vm232_vm1 = vcmp.ge.f32.partialorder %v1279_v32, 0.0  ;;  %v236_v35 = vmul.f32 0.2, %v1279_v32  ;;  %v1284_v36 = vadd.f32 %v859_v27, %v217_v33  ;;  %v237_v40 = vsel %vm229_vm2, %v1275_v29, %v233_v34  ;;  %v1163_v27 = vld [vmem:[%s1399_s2 + $0xf0] sm:$0xff]   ;;  %v921_v33 = vld [vmem:[%s1400_s3 + $0x2] ss:$0 sm:$0xff] }
 0x19d   :  { %v234_v38 = vmul.f32 0.2, %v1284_v36  ;;  %vm230_vm4 = vcmp.ge.f32.partialorder %v1284_v36, 0.0  ;;  %v240_v39 = vsel %vm232_vm1, %v1279_v32, %v236_v35 }
 0x19e   :  { %v242_v44 = vpack.c.bf16 %v240_v39, %v239_v43 }
 0x19f   :  { %v238_v41 = vsel %vm230_vm4, %v1284_v36, %v234_v38 }
 0x1a0   :  { %v241_v42 = vpack.c.bf16 %v238_v41, %v237_v40 }
 0x1a2   :  { %1056 = vmatprep.mubr.bf16.mxu0 %v241_v42 }
 0x1a3   :  { %1057 = vmatmul.mubr.bf16.vlgmr.msra.gmra.mxu0 %v242_v44 }
 0x1a4   :  { %1069 = vmatpush3.bf16.msra.mxu0 %v1154_v45 }
 0x1a5   :  { %1070 = vmatprep.subr.bf16.mxu0 %v1155_v46 }
 0x1a8   :  { %1071 = vmatpush3.bf16.msra.mxu0 %v1155_v46 }
 0x1a9   :  { %1072 = vmatprep.subr.bf16.mxu0 %v1156_v47 }
 0x1ac   :  { %1073 = vmatpush3.bf16.msra.mxu0 %v1156_v47 }
 0x1ad   :  { %1074 = vmatprep.subr.bf16.mxu0 %v1157_v48 }
 0x1b0   :  { %1075 = vmatpush3.bf16.msra.mxu0 %v1157_v48 }
 0x1b1   :  { %1076 = vmatprep.subr.bf16.mxu0 %v1158_v55 }
 0x1b4   :  { %1077 = vmatpush3.bf16.msra.mxu0 %v1158_v55 }
 0x1b5   :  { %1078 = vmatprep.subr.bf16.mxu0 %v1159_v56 }
 0x1b8   :  { %1079 = vmatpush3.bf16.msra.mxu0 %v1159_v56 }
 0x1b9   :  { %1080 = vmatprep.subr.bf16.mxu0 %v1160_v57 }
 0x1bc   :  { %1081 = vmatpush3.bf16.msra.mxu0 %v1160_v57 }
 0x1bd   :  { %1082 = vmatprep.subr.bf16.mxu0 %v1161_v58 }
 0x1c0   :  { %1083 = vmatpush3.bf16.msra.mxu0 %v1161_v58 }
 0x263   :  { %v1058_v49 = vpop.f32.mrf.mxu0 }
 0x265   :  { %v342_v50 = vpop.f32.mrf.mxu0 }
 0x267   :  { %v1059_v51 = vpop.f32.mrf.mxu0 }
 0x268   :  { %v358_v52 = vpack.c.bf16 %v1059_v51, %v1058_v49 }
 0x269   :  { %v345_v53 = vpop.f32.mrf.mxu0 }
 0x26a   :  { %v357_v54 = vpack.c.bf16 %v345_v53, %v342_v50  ;;  %1060 = vmatprep.subr.bf16.mxu1 %v358_v52 }
 0x26b   :  { %1061 = vmatpush3.bf16.msra.mxu1 %v358_v52 }
 0x26c   :  { %1062 = vmatprep.subr.bf16.mxu1 %v357_v54 }
 0x26f   :  { %1063 = vmatpush3.bf16.msra.mxu1 %v357_v54 }
 0x272   :  { %1065 = vmatmul.mubr.msk.bf16.vlgmr.msra.gmra.mxu1 %vm51_vm0, %v1224_v5 }
 0x273   :  { %1092 = vmatprep.mubr.msk.bf16.mxu1 %vm51_vm0, %v1211_v2 }
 0x332   :  { %v1066_v60 = vpop.f32.mrf.mxu1 }
 0x333   :  { %v410_v61 = vadd.f32 %v1066_v60, %v893_v59 }
 0x334   :  { %v401_v62 = vpop.f32.mrf.mxu1 }
 0x335   :  { %v402_v63 = vadd.f32 %v893_v59, %v401_v62  ;;  %v1330_v4 = vadd.f32 %v410_v61, %v1277_v30  ;;  %v1167_v30 = vld [vmem:[%s1399_s2 + $0xd0] sm:$0xff]   ;;  %v1170_v62 = vmov 0.0  }
 0x336   :  { %v1067_v0 = vpop.f32.mrf.mxu1 }
 0x337   :  { %v1327_v1 = vadd.f32 %v402_v63, %v1275_v29  ;;  %v413_v3 = vadd.f32 %v1067_v0, %v893_v59  ;;  %v426_v12 = vmul.f32 0.2, %v1330_v4  ;;  %vm422_vm7 = vcmp.ge.f32.partialorder %v1330_v4, 0.0  ;;  %v1166_v29 = vld [vmem:[%s1399_s2 + $0xd8] sm:$0xff]   ;;  %v949_v0 = vld [vmem:[%s1400_s3 + $0x3] ss:$0 sm:$0xff] }
 0x338   :  { %v404_v6 = vpop.f32.mrf.mxu1 }
 0x339   :  { %v1333_v7 = vadd.f32 %v413_v3, %v1279_v32  ;;  %v405_v8 = vadd.f32 %v893_v59, %v404_v6  ;;  %v424_v11 = vmul.f32 0.2, %v1327_v1  ;;  %vm420_vm6 = vcmp.ge.f32.partialorder %v1327_v1, 0.0  ;;  %v1169_v32 = vld [vmem:[%s1399_s2 + $0xc0] sm:$0xff]  }
 0x33a   :  { %v430_v18 = vsel %vm422_vm7, %v1330_v4, %v426_v12 }
 0x33b   :  { %vm423_vm5 = vcmp.ge.f32.partialorder %v1333_v7, 0.0  ;;  %v427_v9 = vmul.f32 0.2, %v1333_v7  ;;  %v1338_v10 = vadd.f32 %v405_v8, %v1284_v36  ;;  %v428_v15 = vsel %vm420_vm6, %v1327_v1, %v424_v11 }
 0x33d   :  { %vm421_vm8 = vcmp.ge.f32.partialorder %v1338_v10, 0.0  ;;  %v425_v13 = vmul.f32 0.2, %v1338_v10  ;;  %v431_v14 = vsel %vm423_vm5, %v1333_v7, %v427_v9 }
 0x33e   :  { %v433_v19 = vpack.c.bf16 %v431_v14, %v430_v18 }
 0x33f   :  { %v429_v16 = vsel %vm421_vm8, %v1338_v10, %v425_v13 }
 0x340   :  { %v432_v17 = vpack.c.bf16 %v429_v16, %v428_v15  ;;  %v802_v15 = vld [vmem:[%s1401_s4] sm:$0xf] }
 0x342   :  { %1084 = vmatprep.mubr.bf16.mxu0 %v432_v17 }
 0x343   :  { %1085 = vmatmul.mubr.bf16.vlgmr.msra.gmra.mxu0 %v433_v19 }
 0x344   :  { %1120 = vmatprep.mubr.msk.bf16.mxu0 %vm51_vm0, %v1211_v2  ;;  %v1164_v2 = vld [vmem:[%s1399_s2 + $0xe8] sm:$0xff]  }
 0x403   :  { %v1086_v20 = vpop.f32.mrf.mxu0 }
 0x405   :  { %v533_v21 = vpop.f32.mrf.mxu0 }
 0x407   :  { %v1087_v22 = vpop.f32.mrf.mxu0 }
 0x408   :  { %v549_v23 = vpack.c.bf16 %v1087_v22, %v1086_v20 }
 0x409   :  { %v536_v24 = vpop.f32.mrf.mxu0 }
 0x40a   :  { %v548_v25 = vpack.c.bf16 %v536_v24, %v533_v21  ;;  %1088 = vmatprep.subr.bf16.mxu1 %v549_v23 }
 0x40b   :  { %1089 = vmatpush3.bf16.msra.mxu1 %v549_v23 }
 0x40c   :  { %1090 = vmatprep.subr.bf16.mxu1 %v548_v25 }
 0x40f   :  { %1091 = vmatpush3.bf16.msra.mxu1 %v548_v25 }
 0x410   :  { %1096 = vmatprep.subr.bf16.mxu1 %v1162_v26 }
 0x412   :  { %1093 = vmatmul.mubr.msk.bf16.vlgmr.msra.gmra.mxu1 %vm51_vm0, %v1224_v5 }
 0x413   :  { %1097 = vmatpush3.bf16.msra.mxu1 %v1162_v26 }
 0x414   :  { %1098 = vmatprep.subr.bf16.mxu1 %v1163_v27 }
 0x417   :  { %1099 = vmatpush3.bf16.msra.mxu1 %v1163_v27 }
 0x418   :  { %1100 = vmatprep.subr.bf16.mxu1 %v1164_v2 }
 0x41b   :  { %1101 = vmatpush3.bf16.msra.mxu1 %v1164_v2 }
 0x41c   :  { %1102 = vmatprep.subr.bf16.mxu1 %v1165_v28 }
 0x41f   :  { %1103 = vmatpush3.bf16.msra.mxu1 %v1165_v28 }
 0x420   :  { %1104 = vmatprep.subr.bf16.mxu1 %v1166_v29 }
 0x423   :  { %1105 = vmatpush3.bf16.msra.mxu1 %v1166_v29 }
 0x424   :  { %1106 = vmatprep.subr.bf16.mxu1 %v1167_v30 }
 0x427   :  { %1107 = vmatpush3.bf16.msra.mxu1 %v1167_v30 }
 0x428   :  { %1108 = vmatprep.subr.bf16.mxu1 %v1168_v31 }
 0x42b   :  { %1109 = vmatpush3.bf16.msra.mxu1 %v1168_v31 }
 0x42c   :  { %1110 = vmatprep.subr.bf16.mxu1 %v1169_v32 }
 0x42f   :  { %1111 = vmatpush3.bf16.msra.mxu1 %v1169_v32 }
 0x4d2   :  { %v1094_v34 = vpop.f32.mrf.mxu1 }
 0x4d3   :  { %v601_v35 = vadd.f32 %v1094_v34, %v921_v33 }
 0x4d4   :  { %v592_v36 = vpop.f32.mrf.mxu1 }
 0x4d5   :  { %v593_v37 = vadd.f32 %v921_v33, %v592_v36  ;;  %v609_v41 = vadd.f32 %v601_v35, %v1330_v4 }
 0x4d6   :  { %v1095_v38 = vpop.f32.mrf.mxu1 }
 0x4d7   :  { %v607_v39 = vadd.f32 %v593_v37, %v1327_v1  ;;  %v604_v40 = vadd.f32 %v1095_v38, %v921_v33  ;;  %v617_v48 = vmul.f32 0.2, %v609_v41  ;;  %vm613_vm11 = vcmp.ge.f32.partialorder %v609_v41, 0.0 }
 0x4d8   :  { %v595_v42 = vpop.f32.mrf.mxu1 }
 0x4d9   :  { %v610_v43 = vadd.f32 %v604_v40, %v1333_v7  ;;  %v596_v44 = vadd.f32 %v921_v33, %v595_v42  ;;  %v615_v47 = vmul.f32 0.2, %v607_v39  ;;  %vm611_vm10 = vcmp.ge.f32.partialorder %v607_v39, 0.0 }
 0x4da   :  { %v621_v54 = vsel %vm613_vm11, %v609_v41, %v617_v48 }
 0x4db   :  { %vm614_vm9 = vcmp.ge.f32.partialorder %v610_v43, 0.0  ;;  %v618_v45 = vmul.f32 0.2, %v610_v43  ;;  %v608_v46 = vadd.f32 %v596_v44, %v1338_v10  ;;  %v619_v51 = vsel %vm611_vm10, %v607_v39, %v615_v47 }
 0x4dd   :  { %vm612_vm12 = vcmp.ge.f32.partialorder %v608_v46, 0.0  ;;  %v616_v49 = vmul.f32 0.2, %v608_v46  ;;  %v622_v50 = vsel %vm614_vm9, %v610_v43, %v618_v45 }
 0x4de   :  { %v624_v55 = vpack.c.bf16 %v622_v50, %v621_v54 }
 0x4df   :  { %v620_v52 = vsel %vm612_vm12, %v608_v46, %v616_v49 }
 0x4e0   :  { %v623_v53 = vpack.c.bf16 %v620_v52, %v619_v51 }
 0x4e2   :  { %1112 = vmatprep.mubr.bf16.mxu1 %v623_v53 }
 0x4e3   :  { %1113 = vmatmul.mubr.bf16.vlgmr.msra.gmra.mxu1 %v624_v55 }
 0x5a3   :  { %v1114_v56 = vpop.f32.mrf.mxu1 }
 0x5a5   :  { %v724_v57 = vpop.f32.mrf.mxu1 }
 0x5a7   :  { %v1115_v58 = vpop.f32.mrf.mxu1 }
 0x5a8   :  { %v740_v59 = vpack.c.bf16 %v1115_v58, %v1114_v56 }
 0x5a9   :  { %v727_v60 = vpop.f32.mrf.mxu1 }
 0x5aa   :  { %v739_v61 = vpack.c.bf16 %v727_v60, %v724_v57  ;;  %1116 = vmatprep.subr.bf16.mxu0 %v740_v59 }
 0x5ab   :  { %1117 = vmatpush3.bf16.msra.mxu0 %v740_v59 }
 0x5ac   :  { %1118 = vmatprep.subr.bf16.mxu0 %v739_v61 }
 0x5af   :  { %1119 = vmatpush3.bf16.msra.mxu0 %v739_v61 }
 0x5b0   :  { %1124 = vmatprep.subr.bf16.mxu0 %v1170_v62 }
 0x5b2   :  { %1121 = vmatmul.mubr.msk.bf16.vlgmr.msra.gmra.mxu0 %vm51_vm0, %v1224_v5 }
 0x5b3   :  { %1128 = vmatprep.mubr.msk.bf16.mxu0 %vm1171_vm13, %v1170_v62 }
 0x672   :  { %v1122_v63 = vpop.f32.mrf.mxu0 }
 0x673   :  { %v792_v3 = vadd.f32 %v1122_v63, %v949_v0 }
 0x674   :  { %v783_v1 = vpop.f32.mrf.mxu0 }
 0x675   :  { %v800_v8 = vadd.f32 %v792_v3, %v609_v41  ;;  %v784_v9 = vadd.f32 %v949_v0, %v783_v1 }
 0x676   :  { %v1123_v4 = vpop.f32.mrf.mxu0 }
 0x677   :  { %v795_v6 = vadd.f32 %v1123_v4, %v949_v0  ;;  %v798_v13 = vadd.f32 %v784_v9, %v607_v39 }
 0x678   :  { %v786_v7 = vpop.f32.mrf.mxu0 }
 0x679   :  { %v801_v10 = vadd.f32 %v795_v6, %v610_v43  ;;  %v787_v11 = vadd.f32 %v949_v0, %v786_v7 }
 0x67b   :  { %v804_v12 = vpack.c.bf16 %v801_v10, %v800_v8  ;;  %v799_v5 = vadd.f32 %v787_v11, %v608_v46 }
 0x67d   :  { %1125 = vmatpush3.bf16.msra.mxu0 %v804_v12  ;;  %v803_v14 = vpack.c.bf16 %v799_v5, %v798_v13 }
 0x67e   :  { %1126 = vmatprep.subr.bf16.mxu0 %v1170_v62 }
 0x681   :  { %1127 = vmatpush3.bf16.msra.mxu0 %v803_v14 }
 0x684   :  { %1129 = vmatmul.mubr.msk.bf16.vlgmr.msra.gmra.mxu0 %vm51_vm0, %v802_v15 }
 0x744   :  { %v842_v16 = vpop.f32.mrf.mxu0 }
 0x745   :  { %848 = vst [vmem:[%s1402_s5] sm:$0xff] %v842_v16 }
 0x746   :  { %v1130_v17 = vpop.f32.mrf.mxu0 }
 0x748   :  { %v845_v18 = vpop.f32.mrf.mxu0 }
 0x74a   :  { %v1131_v19 = vpop.f32.mrf.mxu0 }

</bundles_post_ra>
